<compile_context>
chip_gen: v6e
topology: v6e:2x2x1
jax: 0.10.0
libtpu: 0.0.40
codegen_flags: <defaults>
</compile_context>

<pallas_src>
import functools

import jax
import jax.numpy as jnp
from jax.experimental import pallas as pl
from jax.experimental.pallas import tpu as pltpu

RMS_EPS = 1e-6


def _round_up(x, m):
    return (x + m - 1) // m * m


def _device_kind():
    try:
        return jax.devices()[0].device_kind.lower()
    except Exception:
        return ""


def _vmem_capacity_bytes():
    try:
        cap = getattr(pltpu.get_tpu_info(), "vmem_capacity_bytes", None)
        if cap:
            return int(cap)
    except Exception:
        pass
    # Fallback by generation: v7x has 64 MiB per TensorCore, v5e/v6e 128 MiB.
    return (64 << 20) if "v7" in _device_kind() else (128 << 20)


def _default_tiles():
    """Per-chip (token_tile, inter_tile) picked against roofline balance.

    Arithmetic intensity of this kernel ~ TM flops per weight byte (weights are
    re-streamed per token tile), so TM must exceed the chip's flops/byte
    balance for prefill to be MXU-bound:
      v5e ~240 fl/B -> TM=256 (shrink TI, not TM, when VMEM-tight)
      v6e ~650 fl/B -> TM=512, large TI cuts accumulator RMW + step overhead
      v7x ~310 fl/B -> TM=384, TI=512, within the 64 MiB VMEM budget
    """
    kind = _device_kind()
    if "v5 lite" in kind or "v5e" in kind or "v5lite" in kind:
        return 256, 256
    if "v7" in kind or _vmem_capacity_bytes() <= (64 << 20):
        return 384, 512
    return 512, 1024


def _shard_mlp_kernel(x_ref, gate_ref, up_ref, down_ref, o_ref, xn_ref, acc_ref):
    # x_ref:    [TM, H]  token tile (resident across the inter axis)
    # gate_ref: [H, TI]  gate projection slice, [K, N] layout, rms_w folded in
    # up_ref:   [H, TI]  up projection slice,   [K, N] layout, rms_w folded in
    # down_ref: [TI, H]  down projection slice, [K, N] layout
    # o_ref:    [TM, H]  output tile (residual added)
    # xn_ref:   [TM, H]  weight-dtype scratch: normalized activations
    # acc_ref:  [TM, H]  f32 scratch: down-proj accumulator
    j = pl.program_id(1)

    # --- RMSNorm once per token tile + accumulator init ---
    @pl.when(j == 0)
    def _():
        x = x_ref[...].astype(jnp.float32)
        var = jnp.mean(x * x, axis=-1, keepdims=True)
        # rms_w is folded into the gate/up weight rows offline; cache xn once
        # in the weight dtype so later inter steps skip the reload+cast.
        xn_ref[...] = (x * jax.lax.rsqrt(var + RMS_EPS)).astype(xn_ref.dtype)
        acc_ref[...] = jnp.zeros_like(acc_ref)

    xn = xn_ref[...]

    # --- gate/up matmuls (MXU, f32 accumulation) ---
    gate = jnp.dot(xn, gate_ref[...], preferred_element_type=jnp.float32)  # [TM,TI]
    up = jnp.dot(xn, up_ref[...], preferred_element_type=jnp.float32)      # [TM,TI]

    # --- SwiGLU: silu(gate) * up (VPU/EUP, f32) ---
    h = gate * jax.lax.logistic(gate) * up                                 # [TM,TI]

    # --- partial down matmul, accumulate in f32 ---
    acc_ref[...] += jnp.dot(h.astype(down_ref.dtype), down_ref[...],
                            preferred_element_type=jnp.float32)            # [TM,H]

    # --- residual + writeback on last inter tile ---
    @pl.when(j == pl.num_programs(1) - 1)
    def _():
        o_ref[...] = (x_ref[...].astype(jnp.float32)
                      + acc_ref[...]).astype(o_ref.dtype)


class PallasModelShardMLP:
    """One decoder-shard MLP (the delegated hot path of ModelShard.forward).

    Weight preprocessing (transpose to MXU-natural [K,N], fold rms_w into
    gate/up rows, pad the intermediate dim) happens ONCE at construction —
    matching ModelShard's load-time weight handling — so each forward streams
    weights from HBM exactly once with no per-call layout traffic.
    """

    def __init__(self, rms_w, up_gate_proj, down_proj, *,
                 token_tile=None, inter_tile=None, weight_buffers=None):
        two_i, H = up_gate_proj.shape
        I = two_i // 2
        assert down_proj.shape == (H, I)
        assert rms_w.shape == (H,)

        tm_def, ti_def = _default_tiles()
        self.token_tile = int(token_tile or tm_def)
        self.inter_tile = int(inter_tile or ti_def)
        self.weight_buffers = weight_buffers  # pl.Buffered(n) sweep knob (v7x)
        self.H, self.I = H, I
        self.wdt = up_gate_proj.dtype
        self.vmem_cap = _vmem_capacity_bytes()

        self.TI = min(self.inter_tile, _round_up(I, 128))
        self.I_pad = _round_up(I, self.TI)

        # ---- one-time weight preprocessing (never per forward) ----
        rms_f = rms_w.astype(jnp.float32)
        gate_w = (up_gate_proj[:I, :].astype(jnp.float32)
                  * rms_f[None, :]).T.astype(self.wdt)        # [H, I]
        up_w = (up_gate_proj[I:, :].astype(jnp.float32)
                * rms_f[None, :]).T.astype(self.wdt)          # [H, I]
        down_w = down_proj.T                                  # [I, H]
        if self.I_pad != I:
            gate_w = jnp.pad(gate_w, ((0, 0), (0, self.I_pad - I)))
            up_w = jnp.pad(up_w, ((0, 0), (0, self.I_pad - I)))
            down_w = jnp.pad(down_w, ((0, self.I_pad - I), (0, 0)))
        self.gate_w = jax.block_until_ready(gate_w)
        self.up_w = jax.block_until_ready(up_w)
        self.down_w = jax.block_until_ready(down_w)

        # TODO(synk): v7x decode (n_tok==1): split the inter axis across the
        #             two TensorCores (pl.core_map / leading core axis with
        #             per-core partial accumulators) so both cores stream
        #             weights; single-program "parallel" axis leaves one idle.
        # TODO(synk): optional fp8 weight path on v7x (per-channel scales,
        #             MXU-native fp8) to halve weight-streaming bytes.

    def __call__(self, x):
        return self.forward(x)

    def forward(self, x):
        T, H = x.shape
        assert H == self.H
        TM = min(self.token_tile, _round_up(max(T, 1), 8))
        T_pad = _round_up(T, TM)
        x_p = x if T_pad == T else jnp.pad(x, ((0, T_pad - T), (0, 0)))

        TI, I_pad = self.TI, self.I_pad
        n_tok, n_int = T_pad // TM, I_pad // TI
        wbytes = jnp.dtype(self.wdt).itemsize
        abytes = jnp.dtype(x.dtype).itemsize
        nbuf = self.weight_buffers or 2

        cost = pl.CostEstimate(
            flops=int(6 * T_pad * H * I_pad),
            transcendentals=int(T_pad * I_pad + T_pad),
            bytes_accessed=int(n_tok * 3 * H * I_pad * wbytes
                               + 2 * T_pad * H * abytes),
        )

        # VMEM estimate incl. compiler temporaries; clamp to physical VMEM.
        vmem_est = (2 * TM * H * abytes            # x tile (double-buffered)
                    + 2 * TM * H * abytes          # out tile
                    + nbuf * 3 * TI * H * wbytes   # gate/up/down weight tiles
                    + TM * H * wbytes              # xn scratch
                    + TM * H * 4                   # acc scratch (f32)
                    + 3 * TM * TI * 4              # gate/up/h f32 temporaries
                    + TM * H * 4)                  # down-matmul f32 result
        vmem_limit = int(min(max(vmem_est + (16 << 20), 48 << 20),
                             self.vmem_cap - (4 << 20)))

        def w_spec(shape, idx):
            if self.weight_buffers is not None and self.weight_buffers != 2:
                return pl.BlockSpec(shape, idx,
                                    pipeline_mode=pl.Buffered(self.weight_buffers))
            return pl.BlockSpec(shape, idx)

        out = pl.pallas_call(
            _shard_mlp_kernel,
            out_shape=jax.ShapeDtypeStruct((T_pad, H), x.dtype),
            grid_spec=pltpu.PrefetchScalarGridSpec(
                num_scalar_prefetch=0,
                grid=(n_tok, n_int),
                in_specs=[
                    pl.BlockSpec((TM, H), lambda i, j: (i, 0)),   # x (resident over j)
                    w_spec((H, TI), lambda i, j: (0, j)),         # gate [K, N]
                    w_spec((H, TI), lambda i, j: (0, j)),         # up   [K, N]
                    w_spec((TI, H), lambda i, j: (j, 0)),         # down [K, N]
                ],
                out_specs=pl.BlockSpec((TM, H), lambda i, j: (i, 0)),
                scratch_shapes=[
                    pltpu.VMEM((TM, H), self.wdt),      # xn (weight dtype)
                    pltpu.VMEM((TM, H), jnp.float32),   # acc
                ],
            ),
            compiler_params=pltpu.CompilerParams(
                dimension_semantics=("parallel", "arbitrary"),
                vmem_limit_bytes=vmem_limit,
            ),
            cost_estimate=cost,
        )(x_p, self.gate_w, self.up_w, self.down_w)

        return out[:T] if T_pad != T else out


def _reference(x, rms_w, up_gate_proj, down_proj):
    I = up_gate_proj.shape[0] // 2
    xf = x.astype(jnp.float32)
    var = jnp.mean(xf * xf, axis=-1, keepdims=True)
    xn = xf * jax.lax.rsqrt(var + RMS_EPS) * rms_w.astype(jnp.float32)
    gu = xn @ up_gate_proj.astype(jnp.float32).T
    gate, up = gu[:, :I], gu[:, I:]
    h = gate * jax.nn.sigmoid(gate) * up
    y = h @ down_proj.astype(jnp.float32).T
    return (xf + y).astype(x.dtype)


if __name__ == "__main__":
    # Small synthetic shapes consistent with the module's forward.
    # T=12 exercises token-tile padding (TM -> 16); I=768 with inter_tile=256
    # exercises the multi-step intermediate-dim accumulation and I padding.
    T, H, I = 12, 256, 768
    key = jax.random.PRNGKey(0)
    k_x, k_ug, k_d, k_rms = jax.random.split(key, 4)

    x = jax.random.normal(k_x, (T, H), dtype=jnp.float32)
    rms_w = 1.0 + 0.01 * jax.random.normal(k_rms, (H,), dtype=jnp.float32)
    up_gate_proj = 0.05 * jax.random.normal(k_ug, (2 * I, H), dtype=jnp.float32)
    down_proj = 0.05 * jax.random.normal(k_d, (H, I), dtype=jnp.float32)

    # f32 path (test-only; production weights are bf16/fp8).
    shard = PallasModelShardMLP(rms_w, up_gate_proj, down_proj,
                                token_tile=256, inter_tile=256)
    out = jax.block_until_ready(shard(x))
    ref = _reference(x, rms_w, up_gate_proj, down_proj)
    assert out.shape == (T, H)
    max_err = float(jnp.max(jnp.abs(out - ref)))
    assert jnp.allclose(out, ref, atol=3e-2, rtol=3e-2), max_err

    # bf16 path: weights preprocessed once (f32 fold), streamed as bf16,
    # MXU accumulates in f32.
    rb = rms_w.astype(jnp.bfloat16)
    ugb = up_gate_proj.astype(jnp.bfloat16)
    db = down_proj.astype(jnp.bfloat16)
    shard_b = PallasModelShardMLP(rb, ugb, db, token_tile=256, inter_tile=256)
    xb = x.astype(jnp.bfloat16)
    out_b = jax.block_until_ready(shard_b(xb))
    ref_b = _reference(xb, rb, ugb, db).astype(jnp.float32)
    assert out_b.shape == (T, H)
    assert jnp.allclose(out_b.astype(jnp.float32), ref_b, atol=1.5e-1, rtol=1.5e-1)

    print("KERNEL_OK")
</pallas_src>

<mosaic_0001>
module attributes {stable_mosaic.version = 11 : i64} {
  func.func @_shard_mlp_kernel(%arg0: i32, %arg1: i32, %arg2: memref<16x256xf32, #tpu.memory_space<vmem>>, %arg3: memref<256x256xf32, #tpu.memory_space<vmem>>, %arg4: memref<256x256xf32, #tpu.memory_space<vmem>>, %arg5: memref<256x256xf32, #tpu.memory_space<vmem>>, %arg6: memref<16x256xf32, #tpu.memory_space<vmem>>, %arg7: memref<16x256xf32, #tpu.memory_space<vmem>>, %arg8: memref<16x256xf32, #tpu.memory_space<vmem>>) attributes {dimension_semantics = [#tpu.dimension_semantics<parallel>, #tpu.dimension_semantics<arbitrary>], iteration_bounds = array<i64: 1, 3>, scalar_prefetch = 0 : i64, scratch_operands = 2 : i64, tpu.core_type = #tpu.core_type<tc>, window_params = [{transform_indices = @transform_0, window_bounds = array<i64: 16, 256>}, {transform_indices = @transform_1, window_bounds = array<i64: 256, 256>}, {transform_indices = @transform_2, window_bounds = array<i64: 256, 256>}, {transform_indices = @transform_3, window_bounds = array<i64: 256, 256>}, {transform_indices = @transform_4, window_bounds = array<i64: 16, 256>}]} {
    %c0_i32 = arith.constant 0 : i32
    %0 = arith.cmpi eq, %arg1, %c0_i32 : i32
    %1 = arith.extui %0 : i1 to i32
    %c0_i32_0 = arith.constant 0 : i32
    %2 = arith.cmpi ne, %1, %c0_i32_0 : i32
    scf.if %2 {
      %c0_16 = arith.constant 0 : index
      %c0_17 = arith.constant 0 : index
      %23 = vector.load %arg2[%c0_16, %c0_17] : memref<16x256xf32, #tpu.memory_space<vmem>>, vector<16x256xf32>
      %24 = arith.mulf %23, %23 : vector<16x256xf32>
      %cst_18 = arith.constant dense<0.000000e+00> : vector<16xf32>
      %25 = vector.multi_reduction <add>, %24, %cst_18 [1] : vector<16x256xf32> to vector<16xf32>
      %26 = vector.shape_cast %25 : vector<16xf32> to vector<16x1xf32>
      %cst_19 = arith.constant 2.560000e+02 : f32
      %27 = vector.broadcast %cst_19 : f32 to vector<16x1xf32>
      %28 = arith.divf %26, %27 : vector<16x1xf32>
      %cst_20 = arith.constant 9.99999997E-7 : f32
      %29 = vector.broadcast %cst_20 : f32 to vector<16x1xf32>
      %30 = arith.addf %28, %29 : vector<16x1xf32>
      %31 = math.rsqrt %30 : vector<16x1xf32>
      %32 = vector.broadcast %31 : vector<16x1xf32> to vector<16x256xf32>
      %33 = arith.mulf %23, %32 : vector<16x256xf32>
      %c0_21 = arith.constant 0 : index
      %c0_22 = arith.constant 0 : index
      %34 = vector.load %arg7[%c0_21, %c0_22] : memref<16x256xf32, #tpu.memory_space<vmem>>, vector<16x256xf32>
      tpu.vector_store %arg7[%c0_21, %c0_22], %33 {strides = array<i32>} : memref<16x256xf32, #tpu.memory_space<vmem>>, vector<16x256xf32>,
      %cst_23 = arith.constant 0.000000e+00 : f32
      %35 = vector.broadcast %cst_23 : f32 to vector<16x256xf32>
      %c0_24 = arith.constant 0 : index
      %c0_25 = arith.constant 0 : index
      %36 = vector.load %arg8[%c0_24, %c0_25] : memref<16x256xf32, #tpu.memory_space<vmem>>, vector<16x256xf32>
      tpu.vector_store %arg8[%c0_24, %c0_25], %35 {strides = array<i32>} : memref<16x256xf32, #tpu.memory_space<vmem>>, vector<16x256xf32>,
    } else {
    }
    %c0 = arith.constant 0 : index
    %c0_1 = arith.constant 0 : index
    %3 = vector.load %arg7[%c0, %c0_1] : memref<16x256xf32, #tpu.memory_space<vmem>>, vector<16x256xf32>
    %c0_2 = arith.constant 0 : index
    %c0_3 = arith.constant 0 : index
    %4 = vector.load %arg3[%c0_2, %c0_3] : memref<256x256xf32, #tpu.memory_space<vmem>>, vector<256x256xf32>
    %cst = arith.constant dense<0.000000e+00> : vector<16x256xf32>
    %5 = tpu.matmul %3, %4, %cst {dimension_numbers = #tpu.dot_dimension_numbers<[1], [0], [0], [1], [0, 0, 1, 1], [], []>} : vector<16x256xf32>, vector<256x256xf32>, vector<16x256xf32> -> vector<16x256xf32>
    %c0_4 = arith.constant 0 : index
    %c0_5 = arith.constant 0 : index
    %6 = vector.load %arg4[%c0_4, %c0_5] : memref<256x256xf32, #tpu.memory_space<vmem>>, vector<256x256xf32>
    %cst_6 = arith.constant dense<0.000000e+00> : vector<16x256xf32>
    %7 = tpu.matmul %3, %6, %cst_6 {dimension_numbers = #tpu.dot_dimension_numbers<[1], [0], [0], [1], [0, 0, 1, 1], [], []>} : vector<16x256xf32>, vector<256x256xf32>, vector<16x256xf32> -> vector<16x256xf32>
    %8 = arith.negf %5 : vector<16x256xf32>
    %9 = math.exp %8 : vector<16x256xf32>
    %cst_7 = arith.constant 1.000000e+00 : f32
    %10 = vector.broadcast %cst_7 : f32 to vector<16x256xf32>
    %11 = arith.addf %10, %9 : vector<16x256xf32>
    %12 = arith.divf %10, %11 : vector<16x256xf32>
    %13 = arith.mulf %5, %12 : vector<16x256xf32>
    %14 = arith.mulf %13, %7 : vector<16x256xf32>
    %c0_8 = arith.constant 0 : index
    %c0_9 = arith.constant 0 : index
    %15 = vector.load %arg8[%c0_8, %c0_9] : memref<16x256xf32, #tpu.memory_space<vmem>>, vector<16x256xf32>
    %c0_10 = arith.constant 0 : index
    %c0_11 = arith.constant 0 : index
    %16 = vector.load %arg5[%c0_10, %c0_11] : memref<256x256xf32, #tpu.memory_space<vmem>>, vector<256x256xf32>
    %cst_12 = arith.constant dense<0.000000e+00> : vector<16x256xf32>
    %17 = tpu.matmul %14, %16, %cst_12 {dimension_numbers = #tpu.dot_dimension_numbers<[1], [0], [0], [1], [0, 0, 1, 1], [], []>} : vector<16x256xf32>, vector<256x256xf32>, vector<16x256xf32> -> vector<16x256xf32>
    %18 = arith.addf %15, %17 : vector<16x256xf32>
    %c0_13 = arith.constant 0 : index
    %c0_14 = arith.constant 0 : index
    %19 = vector.load %arg8[%c0_13, %c0_14] : memref<16x256xf32, #tpu.memory_space<vmem>>, vector<16x256xf32>
    tpu.vector_store %arg8[%c0_13, %c0_14], %18 {strides = array<i32>} : memref<16x256xf32, #tpu.memory_space<vmem>>, vector<16x256xf32>,
    %c2_i32 = arith.constant 2 : i32
    %20 = arith.cmpi eq, %arg1, %c2_i32 : i32
    %21 = arith.extui %20 : i1 to i32
    %c0_i32_15 = arith.constant 0 : i32
    %22 = arith.cmpi ne, %21, %c0_i32_15 : i32
    scf.if %22 {
      %c0_16 = arith.constant 0 : index
      %c0_17 = arith.constant 0 : index
      %23 = vector.load %arg2[%c0_16, %c0_17] : memref<16x256xf32, #tpu.memory_space<vmem>>, vector<16x256xf32>
      %c0_18 = arith.constant 0 : index
      %c0_19 = arith.constant 0 : index
      %24 = vector.load %arg8[%c0_18, %c0_19] : memref<16x256xf32, #tpu.memory_space<vmem>>, vector<16x256xf32>
      %25 = arith.addf %23, %24 : vector<16x256xf32>
      %c0_20 = arith.constant 0 : index
      %c0_21 = arith.constant 0 : index
      %26 = vector.load %arg6[%c0_20, %c0_21] : memref<16x256xf32, #tpu.memory_space<vmem>>, vector<16x256xf32>
      tpu.vector_store %arg6[%c0_20, %c0_21], %25 {strides = array<i32>} : memref<16x256xf32, #tpu.memory_space<vmem>>, vector<16x256xf32>,
    } else {
    }
    return
  }
  func.func @transform_0(%arg0: i32, %arg1: i32) -> (i32, i32) {
    %c0_i32 = arith.constant 0 : i32
    %c0_i32_0 = arith.constant 0 : i32
    return %arg0, %c0_i32 : i32, i32
  }
  func.func @transform_1(%arg0: i32, %arg1: i32) -> (i32, i32) {
    %c0_i32 = arith.constant 0 : i32
    %c0_i32_0 = arith.constant 0 : i32
    return %c0_i32, %arg1 : i32, i32
  }
  func.func @transform_2(%arg0: i32, %arg1: i32) -> (i32, i32) {
    %c0_i32 = arith.constant 0 : i32
    %c0_i32_0 = arith.constant 0 : i32
    return %c0_i32, %arg1 : i32, i32
  }
  func.func @transform_3(%arg0: i32, %arg1: i32) -> (i32, i32) {
    %c0_i32 = arith.constant 0 : i32
    %c0_i32_0 = arith.constant 0 : i32
    return %arg1, %c0_i32 : i32, i32
  }
  func.func @transform_4(%arg0: i32, %arg1: i32) -> (i32, i32) {
    %c0_i32 = arith.constant 0 : i32
    %c0_i32_0 = arith.constant 0 : i32
    return %arg0, %c0_i32 : i32, i32
  }
}

</mosaic_0001>

<bundles_post_ra>
// kernel: tpu_custom_call.1
= control target key start
LH: loop header
LB: loop body
LE: loop exit
PB: predicated region body
PF: predicated region fallthrough
CT: control target
= control target key end

     0   :  { %9 = vsyncpa [#allocation5], 0  ;;  %s1828_s0 = inlined_call_operand.hbm [shape: f32[16,256], index: 0, kind: input, shape index: {}]   ;;  %s1829_s1 = inlined_call_operand.hbm [shape: f32[256,768], index: 1, kind: input, shape index: {}]   ;;  %s1830_s2 = inlined_call_operand.hbm [shape: f32[256,768], index: 2, kind: input, shape index: {}]   ;;  %s1831_s3 = inlined_call_operand.hbm [shape: f32[768,256], index: 3, kind: input, shape index: {}]   ;;  %s1832_s4 = inlined_call_operand.hbm [shape: f32[16,256], index: 4, kind: output, shape index: {}]  }
   0x1   :  { %10 = vsyncpa [#allocation8], 0 }
   0x2   :  { %12 = vsyncpa [#allocation8 + $0x1], 0 }
   0x3   :  { %13 = vsyncpa [#allocation11], 0 }
   0x4   :  { %15 = vsyncpa [#allocation11 + $0x1], 0 }
   0x5   :  { %16 = vsyncpa [#allocation6], 0  ;;  %s1427_s15 = smov 0   ;;  %s1429_s16 = smov 0  }
   0x6   :  { %s1431_s17 = smov 0   ;;  %s1433_s18 = smov 0  }
   0x7   :  { %s1435_s19 = smov 0   ;;  %s1437_s20 = smov 0  }
   0x8 LB: > { %s31_s21 = sadd.s32 1, %s1385_s19  ;;  %s67_s22 = sadd.s32 1, %s1377_s17  ;;  %s1389_s20 = sphi %s1437_s20, %s22_s20   ;;  %s1385_s19 = sphi %s1435_s19, %s1842_s19   ;;  %s1381_s18 = sphi %s1433_s18, %s1841_s18   ;;  %s1377_s17 = sphi %s1431_s17, %s1840_s17   ;;  %s1373_s16 = sphi %s1429_s16, %s1839_s16   ;;  %s1369_s15 = sphi %s1427_s15, %s1838_s15  }
   0x9   : > { %p32_p0 = scmp.ge.s32.totalorder %s31_s21, 3  ;;  %p74_p1 = scmp.ne.s32.totalorder %s1377_s17, %s1373_s16 }
   0xa   : > { %p75_p2 = scmp.eq.s32.totalorder %s1389_s20, 0  ;;  %p1113_p5 = scmp.lt.s32.totalorder %s1389_s20, 3 }
   0xb   : > { %s1844_s21 = smov (%p32_p0, %s31_s21), 0  ;;  %s199_s25 = sand.u32 1, %s1389_s20  }
   0xc   : > { %p1464_p3 = por %p75_p2, %p74_p1  ;;  %s64_s24 = ssub.s32 %s1385_s19, %s1844_s21 }
   0xd   : > { %p65_p4 = scmp.eq.s32.totalorder %s64_s24, 0  ;;  %s201_s26 = sand.u32 1, %s1377_s17  }
   0xe   : > { %s1478_s28 = sshll.u32 %s201_s26, 9  ;;  %s1016_s29 = sshll.u32 %s1385_s19, 8 }
   0xf   : > { %s1474_s27 = scalar_select %p65_p4, %s1377_s17, %s67_s22  }
  0x10   : > { %s209_s6 = scalar_lea.hbm %s1829_s1, %s1016_s29  ;;  %s203_s7 = scalar_lea.vmem [#allocation7], %s1478_s28 }
  0x11   : > { %s210_s8 = sshll.u32 %s203_s7, 4  ;;  %p1487_p6 = pnand %p1113_p5, %p1464_p3  ;;  %s211_s8 = int_to_ptr.vmem [resolvable:$true] %s210_s8 }
  0x12   : > { %s1494_s12 = scalar_lea.hbm %s1830_s2, %s1016_s29  ;;  %s1496_s13 = scalar_lea.sflag [#allocation8], %s199_s25 }
  0x13   : > { %p1195_p7 = pneg %p1487_p6  ;;  %s1206_s14 = scalar_lea.vmem %s211_s8, 8192 }
  0x14   : > { %p1207_p8 = scmp.ne.s32.totalorder %s211_s8, %s1206_s14  ;;  %s1391_s22 = smov [#allocation7]  }
  0x15   : > { %s1211_s23 = sshll.u32 %s1391_s22, 4  ;;  %s1212_s23 = int_to_ptr.vmem [resolvable:$false] %s1211_s23 }
  0x16   : > { %p1209_p9 = pnand %p1207_p8, %p1195_p7  ;;  %s1213_s24 = scalar_lea.vmem %s1212_s23, 16384 }
  0x17   : > { %p1214_p11 = scmp.lt.s32.totalorder %s211_s8, %s1212_s23  ;;  %p1215_p12 = scmp.lt.s32.totalorder %s1213_s24, %s1206_s14 }
  0x18   : > { %p1210_p10 = pneg %p1209_p9 }
  0x19   : > { %p1216_p13 = por %p1215_p12, %p1214_p11 }
  0x1b   : > { %p1217_p0 = pnand %p1216_p13, %p1210_p10 }
  0x1d   : > { %1220 = shalt.err (!%p1217_p0)
}
  0x1e   : > { %s1392_s29 = smov 768   ;;  %s1393_s25 = smov 256  }
  0x1f   : > { %s1394_s30 = smov 16   ;;  %s1510_s5 = sadd.s32 4294967295, %s1389_s20  }
  0x20   : > { %1105 = dma.hbm_to_vmem [thread:$0]  (!%p1487_p6), %s209_s6, 8192, %s211_s8, %s1496_s13, %s1392_s29, %s1393_s25, %s1394_s30  }
  0x21   : > { %p80_p1 = scmp.ne.s32.totalorder %s1373_s16, %s1369_s15  ;;  %p81_p2 = scmp.eq.s32.totalorder %s1510_s5, 0 }
  0x22   : > { %p988_p3 = scmp.ge.s32.totalorder %s1389_s20, 1  ;;  %p169_p4 = scmp.lt.s32.totalorder %s1389_s20, 4 }
  0x23   : > { %p1519_p5 = por %p81_p2, %p80_p1  ;;  %s1395_s6 = smov [#allocation4]  }
  0x24   : > { %p1523_p8 = pnand %p988_p3, %p169_p4  ;;  %s185_s8 = sshll.u32 %s1395_s6, 4  ;;  %s1529_s8 = int_to_ptr.vmem [resolvable:$true] %s185_s8 }
  0x25   : > { %s224_s15 = scalar_lea.vmem [#allocation9], %s1478_s28  ;;  %s1396_s23 = smov [#allocation9]  }
  0x26   : > { %p1098_p9 = pneg %p1523_p8  ;;  %s231_s11 = sshll.u32 %s224_s15, 4  ;;  %s232_s11 = int_to_ptr.vmem [resolvable:$true] %s231_s11 }
  0x27   : > { %s1234_s22 = scalar_lea.vmem %s232_s11, 8192  ;;  %s1239_s24 = sshll.u32 %s1396_s23, 4  ;;  %s1240_s24 = int_to_ptr.vmem [resolvable:$false] %s1239_s24 }
  0x28   : > { %p1534_p10 = pnand %p1098_p9, %p81_p2  ;;  %p1235_p11 = scmp.ne.s32.totalorder %s232_s11, %s1234_s22 }
  0x29   : > { %s1241_s6 = scalar_lea.vmem %s1240_s24, 16384  ;;  %p1242_p0 = scmp.lt.s32.totalorder %s232_s11, %s1240_s24 }
  0x2a   : > { %p1237_p12 = pnand %p1235_p11, %p1195_p7  ;;  %p1243_p1 = scmp.lt.s32.totalorder %s1241_s6, %s1234_s22 }
  0x2c   : > { %p1238_p13 = pneg %p1237_p12  ;;  %p1244_p3 = por %p1243_p1, %p1242_p0 }
  0x2e   : > { %p1245_p4 = pnand %p1244_p3, %p1238_p13 }
  0x30   : > { %1248 = shalt.err (!%p1245_p4)
}
  0x31   : > { %1108 = dma.hbm_to_vmem [thread:$0]  (!%p1487_p6), %s1494_s12, 8192, %s232_s11, %s1496_s13, %s1392_s29, %s1393_s25, %s1394_s30  }
  0x32   : > { %p1251_p9 = pneg %p1534_p10  ;;  %s1260_s15 = scalar_lea.vmem %s1529_s8, 512 }
  0x33   : > { %p1261_p11 = scmp.ne.s32.totalorder %s1529_s8, %s1260_s15  ;;  %p1268_p13 = scmp.lt.s32.totalorder %s1529_s8, %s1529_s8 }
  0x34   : > { %p1269_p1 = scmp.lt.s32.totalorder %s1260_s15, %s1260_s15 }
  0x35   : > { %p1263_p12 = pnand %p1261_p11, %p1251_p9 }
  0x36   : > { %p1270_p3 = por %p1269_p1, %p1268_p13 }
  0x37   : > { %p1264_p0 = pneg %p1263_p12 }
  0x39   : > { %p1271_p4 = pnand %p1270_p3, %p1264_p0 }
  0x3b   : > { %1274 = shalt.err (!%p1271_p4)
}
  0x3c   : > { %1101 = dma.hbm_to_vmem [thread:$0]  (!%p1534_p10), %s1828_s0, 512, %s1529_s8, [#allocation5], %s1393_s25, %s1393_s25, %s1394_s30  }
  0x3d   : > { %s1019_s13 = sshll.u32 %s1385_s19, 13  ;;  %s245_s29 = scalar_lea.vmem [#allocation10], %s1478_s28 }
  0x3e   : > { %s253_s11 = sshll.u32 %s245_s29, 4  ;;  %s252_s6 = scalar_lea.hbm %s1831_s3, %s1019_s13  ;;  %s254_s11 = int_to_ptr.vmem [resolvable:$true] %s253_s11 }
  0x3f   : > { %s242_s14 = scalar_lea.sflag [#allocation11], %s201_s26  ;;  %s1288_s15 = scalar_lea.vmem %s254_s11, 8192 }
  0x40   : > { %p1289_p9 = scmp.ne.s32.totalorder %s254_s11, %s1288_s15  ;;  %s1397_s22 = smov [#allocation10]  }
  0x41   : > { %s1293_s12 = sshll.u32 %s1397_s22, 4  ;;  %s1294_s12 = int_to_ptr.vmem [resolvable:$false] %s1293_s12 }
  0x42   : > { %p1291_p11 = pnand %p1289_p9, %p1195_p7  ;;  %s1295_s8 = scalar_lea.vmem %s1294_s12, 16384 }
  0x43   : > { %p1296_p10 = scmp.lt.s32.totalorder %s254_s11, %s1294_s12  ;;  %p1297_p0 = scmp.lt.s32.totalorder %s1295_s8, %s1288_s15 }
  0x44   : > { %p1292_p12 = pneg %p1291_p11 }
  0x45   : > { %p1298_p13 = por %p1297_p0, %p1296_p10 }
  0x47   : > { %p1299_p1 = pnand %p1298_p13, %p1292_p12 }
  0x49   : > { %1302 = shalt.err (!%p1299_p1)
}
  0x4a   : > { %1111 = dma.hbm_to_vmem [thread:$0]  (!%p1487_p6), %s252_s6, 8192, %s254_s11, %s242_s14, %s1393_s25, %s1393_s25, %s1394_s30  }
  0x4b   : > { %265 = sbr.rel (%p1523_p8) target bundleno = 788 (0x314), region = 36 }
  0x50   : > { %1352 = dma.done.wait (%p81_p2), [#allocation5], 512  }
  0x51   : > { %1354 = vsyncadd (%p81_p2), [#allocation5], 4294966784  ;;  %s271_s26 = sand.u32 1, %s1510_s5   ;;  %s273_s28 = sand.u32 1, %s1373_s16  }
  0x52   : > { %s1003_s13 = sshll.u32 %s273_s28, 9  ;;  %s272_s9 = scalar_lea.sflag [#allocation8], %s271_s26 }
  0x53   : > { %s1586_s29 = scalar_lea.vmem [#allocation7], %s1003_s13 }
  0x54   : > { %1356 = dma.done.wait (%p1519_p5), %s272_s9, 16384  }
  0x55   : > { %1358 = vsyncadd (%p1519_p5), %s272_s9, 4294950912  ;;  %s1592_s25 = scalar_lea.vmem [#allocation9], %s1003_s13  ;;  %s290_s30 = scalar_lea.sflag [#allocation11], %s273_s28 }
  0x56   : > { %s1594_s10 = scalar_lea.vmem [#allocation10], %s1003_s13 }
  0x57   : > { %1360 = dma.done.wait (%p1519_p5), %s290_s30, 8192  }
  0x58   : > { %1362 = vsyncadd (%p1519_p5), %s290_s30, 4294959104  ;;  %p1006_p6 = scmp.ne.s32.totalorder %s1381_s18, 0 }
  0x5a   : > { %331 = sbr.rel (%p1006_p6) target bundleno = 263 (0x107), region = 56 }
  0x5f   : > { %v332_v0 = vld [vmem:[#allocation4] sm:$0xff]  ;;  %v333_v1 = vld [vmem:[#allocation4 + $0x8] sm:$0xff]  ;;  %v334_v2 = vld [vmem:[#allocation4 + $0x10] sm:$0xff]  ;;  %v1398_v10 = vmov 0.0  }
  0x60   : > { %v336_v3 = vmul.f32 %v332_v0, %v332_v0  ;;  %v337_v4 = vmul.f32 %v333_v1, %v333_v1  ;;  %v335_v5 = vld [vmem:[#allocation4 + $0x18] sm:$0xff]  ;;  %v338_v6 = vmul.f32 %v334_v2, %v334_v2  ;;  %361 = vst [vmem:[#allocation3] sm:$0xff] %v1398_v10  ;;  %362 = vst [vmem:[#allocation3 + $0x18] sm:$0xff] %v1398_v10 }
  0x61   : > { %v339_v7 = vmul.f32 %v335_v5, %v335_v5  ;;  %363 = vst [vmem:[#allocation3 + $0x8] sm:$0xff] %v1398_v10  ;;  %364 = vst [vmem:[#allocation3 + $0x10] sm:$0xff] %v1398_v10 }
  0x62   : > { %v340_v8 = vadd.f32 %v337_v4, %v336_v3 }
  0x63   : > { %v343_v9 = vadd.f32 %v339_v7, %v338_v6 }
  0x64   : > { %341 = vadd.xlane.f32.xlu0 %v340_v8 }
  0x68   : > { %344 = vadd.xlane.f32.xlu0 %v343_v9 }
  0xed   : > { %v342_v11 = vpop.xlane.xlu0 %341 }
  0xee   : > { %v347_v12 = vmul.f32 0.00390625, %v342_v11 }
  0xf0   : > { %v349_v13 = vadd.f32 1e-06, %v347_v12 }
  0xf1   : > { %v345_v14 = vpop.xlane.xlu0 %344 }
  0xf2   : > { %1173 = vrsqrt.f32 %v349_v13  ;;  %v348_v15 = vmul.f32 0.00390625, %v345_v14 }
  0xf4   : > { %v350_v16 = vadd.f32 1e-06, %v348_v15 }
  0xf6   : > { %1175 = vrsqrt.f32 %v350_v16 }
  0xff   : > { %v1174_v17 = vpop.eup %1173 }
 0x100   : > { %v353_v18 = vmul.f32 %v1174_v17, %v332_v0  ;;  %v354_v19 = vmul.f32 %v1174_v17, %v333_v1 }
 0x102   : > { %357 = vst [vmem:[#allocation2 + $0x10] sm:$0xff] %v353_v18  ;;  %358 = vst [vmem:[#allocation2] sm:$0xff] %v354_v19 }
 0x103   : > { %v1176_v20 = vpop.eup %1175 }
 0x104   : > { %v355_v21 = vmul.f32 %v1176_v20, %v334_v2  ;;  %v356_v22 = vmul.f32 %v1176_v20, %v335_v5 }
 0x106   : > { %359 = vst [vmem:[#allocation2 + $0x18] sm:$0xff] %v355_v21  ;;  %360 = vst [vmem:[#allocation2 + $0x8] sm:$0xff] %v356_v22 }
 0x107 PF: > { %v400_v23 = vld [vmem:[%s1586_s29 + $0xf8] sm:$0xff]  ;;  %v399_v24 = vld [vmem:[%s1586_s29 + $0xf0] sm:$0xff]  ;;  %v398_v25 = vld [vmem:[%s1586_s29 + $0xe8] sm:$0xff]  ;;  %p1011_p7 = scmp.ne.s32.totalorder %s1381_s18, 2 }
 0x108   : > { %433 = vmatprep.subr.mxu0 %v400_v23  ;;  %v397_v26 = vld [vmem:[%s1586_s29 + $0xe0] sm:$0xff]  ;;  %v396_v27 = vld [vmem:[%s1586_s29 + $0xd8] sm:$0xff]  ;;  %v395_v28 = vld [vmem:[%s1586_s29 + $0xd0] sm:$0xff] }
 0x109   : > { %434 = vmatpush1.msra.mxu0 %v399_v24  ;;  %v394_v29 = vld [vmem:[%s1586_s29 + $0xc8] sm:$0xff]  ;;  %v393_v30 = vld [vmem:[%s1586_s29 + $0xc0] sm:$0xff]  ;;  %v392_v31 = vld [vmem:[%s1586_s29 + $0xb8] sm:$0xff] }
 0x10a   : > { %435 = vmatprep.subr.mxu0 %v398_v25  ;;  %v391_v32 = vld [vmem:[%s1586_s29 + $0xb0] sm:$0xff]  ;;  %v390_v33 = vld [vmem:[%s1586_s29 + $0xa8] sm:$0xff]  ;;  %v389_v34 = vld [vmem:[%s1586_s29 + $0xa0] sm:$0xff] }
 0x10b   : > { %436 = vmatpush1.msra.mxu0 %v397_v26  ;;  %v388_v35 = vld [vmem:[%s1586_s29 + $0x98] sm:$0xff]  ;;  %v387_v36 = vld [vmem:[%s1586_s29 + $0x90] sm:$0xff]  ;;  %v386_v39 = vld [vmem:[%s1586_s29 + $0x88] sm:$0xff] }
 0x10c   : > { %437 = vmatprep.subr.mxu0 %v396_v27  ;;  %v541_v37 = vld [vmem:[%s1592_s25 + $0xf8] sm:$0xff]  ;;  %v540_v38 = vld [vmem:[%s1592_s25 + $0xf0] sm:$0xff]  ;;  %v539_v40 = vld [vmem:[%s1592_s25 + $0xe8] sm:$0xff] }
 0x10d   : > { %438 = vmatpush1.msra.mxu0 %v395_v28  ;;  %574 = vmatprep.subr.mxu1 %v541_v37  ;;  %v385_v41 = vld [vmem:[%s1586_s29 + $0x80] sm:$0xff]  ;;  %v537_v43 = vld [vmem:[%s1592_s25 + $0xd8] sm:$0xff]  ;;  %v536_v45 = vld [vmem:[%s1592_s25 + $0xd0] sm:$0xff] }
 0x10e   : > { %439 = vmatprep.subr.mxu0 %v394_v29  ;;  %575 = vmatpush1.msra.mxu1 %v540_v38  ;;  %v538_v42 = vld [vmem:[%s1592_s25 + $0xe0] sm:$0xff]  ;;  %v384_v44 = vld [vmem:[%s1586_s29 + $0x78] sm:$0xff]  ;;  %v383_v46 = vld [vmem:[%s1586_s29 + $0x70] sm:$0xff] }
 0x10f   : > { %440 = vmatpush1.msra.mxu0 %v393_v30  ;;  %576 = vmatprep.subr.mxu1 %v539_v40  ;;  %v535_v47 = vld [vmem:[%s1592_s25 + $0xc8] sm:$0xff]  ;;  %v534_v49 = vld [vmem:[%s1592_s25 + $0xc0] sm:$0xff]  ;;  %v533_v51 = vld [vmem:[%s1592_s25 + $0xb8] sm:$0xff] }
 0x110   : > { %441 = vmatprep.subr.mxu0 %v392_v31  ;;  %577 = vmatpush1.msra.mxu1 %v538_v42  ;;  %v382_v48 = vld [vmem:[%s1586_s29 + $0x68] sm:$0xff]  ;;  %v381_v50 = vld [vmem:[%s1586_s29 + $0x60] sm:$0xff]  ;;  %v380_v52 = vld [vmem:[%s1586_s29 + $0x58] sm:$0xff] }
 0x111   : > { %442 = vmatpush1.msra.mxu0 %v391_v32  ;;  %578 = vmatprep.subr.mxu1 %v537_v43  ;;  %v532_v53 = vld [vmem:[%s1592_s25 + $0xb0] sm:$0xff]  ;;  %v531_v55 = vld [vmem:[%s1592_s25 + $0xa8] sm:$0xff]  ;;  %v530_v57 = vld [vmem:[%s1592_s25 + $0xa0] sm:$0xff] }
 0x112   : > { %443 = vmatprep.subr.mxu0 %v390_v33  ;;  %579 = vmatpush1.msra.mxu1 %v536_v45  ;;  %v379_v54 = vld [vmem:[%s1586_s29 + $0x50] sm:$0xff]  ;;  %v378_v56 = vld [vmem:[%s1586_s29 + $0x48] sm:$0xff]  ;;  %v377_v58 = vld [vmem:[%s1586_s29 + $0x40] sm:$0xff] }
 0x113   : > { %444 = vmatpush1.msra.mxu0 %v389_v34  ;;  %580 = vmatprep.subr.mxu1 %v535_v47  ;;  %v529_v59 = vld [vmem:[%s1592_s25 + $0x98] sm:$0xff]  ;;  %v528_v61 = vld [vmem:[%s1592_s25 + $0x90] sm:$0xff]  ;;  %v527_v63 = vld [vmem:[%s1592_s25 + $0x88] sm:$0xff] }
 0x114   : > { %445 = vmatprep.subr.mxu0 %v388_v35  ;;  %581 = vmatpush1.msra.mxu1 %v534_v49  ;;  %v376_v60 = vld [vmem:[%s1586_s29 + $0x38] sm:$0xff]  ;;  %v375_v62 = vld [vmem:[%s1586_s29 + $0x30] sm:$0xff]  ;;  %v374_v0 = vld [vmem:[%s1586_s29 + $0x28] sm:$0xff] }
 0x115   : > { %446 = vmatpush1.msra.mxu0 %v387_v36  ;;  %582 = vmatprep.subr.mxu1 %v533_v51  ;;  %v526_v1 = vld [vmem:[%s1592_s25 + $0x80] sm:$0xff]  ;;  %v525_v3 = vld [vmem:[%s1592_s25 + $0x78] sm:$0xff]  ;;  %v524_v5 = vld [vmem:[%s1592_s25 + $0x70] sm:$0xff] }
 0x116   : > { %447 = vmatprep.subr.mxu0 %v386_v39  ;;  %583 = vmatpush1.msra.mxu1 %v532_v53  ;;  %v373_v2 = vld [vmem:[%s1586_s29 + $0x20] sm:$0xff]  ;;  %v372_v4 = vld [vmem:[%s1586_s29 + $0x18] sm:$0xff]  ;;  %v371_v6 = vld [vmem:[%s1586_s29 + $0x10] sm:$0xff] }
 0x117   : > { %448 = vmatpush1.msra.mxu0 %v385_v41  ;;  %584 = vmatprep.subr.mxu1 %v531_v55  ;;  %v523_v7 = vld [vmem:[%s1592_s25 + $0x68] sm:$0xff]  ;;  %v522_v9 = vld [vmem:[%s1592_s25 + $0x60] sm:$0xff]  ;;  %v521_v11 = vld [vmem:[%s1592_s25 + $0x58] sm:$0xff] }
 0x118   : > { %449 = vmatprep.subr.mxu0 %v384_v44  ;;  %585 = vmatpush1.msra.mxu1 %v530_v57  ;;  %v370_v8 = vld [vmem:[%s1586_s29 + $0x8] sm:$0xff]  ;;  %v369_v10 = vld [vmem:[%s1586_s29] sm:$0xff]  ;;  %v432_v12 = vld [vmem:[%s1586_s29 + $0x1f8] sm:$0xff] }
 0x119   : > { %450 = vmatpush1.msra.mxu0 %v383_v46  ;;  %586 = vmatprep.subr.mxu1 %v529_v59  ;;  %v520_v13 = vld [vmem:[%s1592_s25 + $0x50] sm:$0xff]  ;;  %v519_v15 = vld [vmem:[%s1592_s25 + $0x48] sm:$0xff]  ;;  %v518_v17 = vld [vmem:[%s1592_s25 + $0x40] sm:$0xff] }
 0x11a   : > { %451 = vmatprep.subr.mxu0 %v382_v48  ;;  %587 = vmatpush1.msra.mxu1 %v528_v61  ;;  %v431_v14 = vld [vmem:[%s1586_s29 + $0x1f0] sm:$0xff]  ;;  %v430_v16 = vld [vmem:[%s1586_s29 + $0x1e8] sm:$0xff]  ;;  %v429_v18 = vld [vmem:[%s1586_s29 + $0x1e0] sm:$0xff] }
 0x11b   : > { %452 = vmatpush1.msra.mxu0 %v381_v50  ;;  %588 = vmatprep.subr.mxu1 %v527_v63  ;;  %v517_v19 = vld [vmem:[%s1592_s25 + $0x38] sm:$0xff]  ;;  %v516_v21 = vld [vmem:[%s1592_s25 + $0x30] sm:$0xff]  ;;  %v515_v23 = vld [vmem:[%s1592_s25 + $0x28] sm:$0xff] }
 0x11c   : > { %453 = vmatprep.subr.mxu0 %v380_v52  ;;  %589 = vmatpush1.msra.mxu1 %v526_v1  ;;  %v428_v20 = vld [vmem:[%s1586_s29 + $0x1d8] sm:$0xff]  ;;  %v427_v22 = vld [vmem:[%s1586_s29 + $0x1d0] sm:$0xff]  ;;  %v426_v24 = vld [vmem:[%s1586_s29 + $0x1c8] sm:$0xff] }
 0x11d   : > { %454 = vmatpush1.msra.mxu0 %v379_v54  ;;  %590 = vmatprep.subr.mxu1 %v525_v3  ;;  %v514_v25 = vld [vmem:[%s1592_s25 + $0x20] sm:$0xff]  ;;  %v513_v27 = vld [vmem:[%s1592_s25 + $0x18] sm:$0xff]  ;;  %v512_v29 = vld [vmem:[%s1592_s25 + $0x10] sm:$0xff] }
 0x11e   : > { %455 = vmatprep.subr.mxu0 %v378_v56  ;;  %591 = vmatpush1.msra.mxu1 %v524_v5  ;;  %v425_v26 = vld [vmem:[%s1586_s29 + $0x1c0] sm:$0xff]  ;;  %v424_v28 = vld [vmem:[%s1586_s29 + $0x1b8] sm:$0xff]  ;;  %v423_v30 = vld [vmem:[%s1586_s29 + $0x1b0] sm:$0xff] }
 0x11f   : > { %456 = vmatpush1.msra.mxu0 %v377_v58  ;;  %592 = vmatprep.subr.mxu1 %v523_v7  ;;  %v511_v31 = vld [vmem:[%s1592_s25 + $0x8] sm:$0xff]  ;;  %v1675_v33 = vld [vmem:[#allocation2] sm:$0xff]  ;;  %v420_v36 = vld [vmem:[%s1586_s29 + $0x198] sm:$0xff] }
 0x120   : > { %457 = vmatprep.subr.mxu0 %v376_v60  ;;  %593 = vmatpush1.msra.mxu1 %v522_v9  ;;  %v422_v32 = vld [vmem:[%s1586_s29 + $0x1a8] sm:$0xff]  ;;  %v421_v34 = vld [vmem:[%s1586_s29 + $0x1a0] sm:$0xff]  ;;  %v573_v37 = vld [vmem:[%s1592_s25 + $0x1f8] sm:$0xff] }
 0x121   : > { %458 = vmatpush1.msra.mxu0 %v375_v62  ;;  %594 = vmatprep.subr.mxu1 %v521_v11  ;;  %v510_v35 = vld [vmem:[%s1592_s25] sm:$0xff]  ;;  %v419_v38 = vld [vmem:[%s1586_s29 + $0x190] sm:$0xff]  ;;  %v418_v40 = vld [vmem:[%s1586_s29 + $0x188] sm:$0xff] }
 0x122   : > { %459 = vmatprep.subr.mxu0 %v374_v0  ;;  %595 = vmatpush1.msra.mxu1 %v520_v13  ;;  %v572_v39 = vld [vmem:[%s1592_s25 + $0x1f0] sm:$0xff]  ;;  %v571_v41 = vld [vmem:[%s1592_s25 + $0x1e8] sm:$0xff]  ;;  %v417_v42 = vld [vmem:[%s1586_s29 + $0x180] sm:$0xff] }
 0x123   : > { %460 = vmatpush1.msra.mxu0 %v373_v2  ;;  %596 = vmatprep.subr.mxu1 %v519_v15  ;;  %v570_v43 = vld [vmem:[%s1592_s25 + $0x1e0] sm:$0xff]  ;;  %v416_v44 = vld [vmem:[%s1586_s29 + $0x178] sm:$0xff]  ;;  %v415_v46 = vld [vmem:[%s1586_s29 + $0x170] sm:$0xff] }
 0x124   : > { %461 = vmatprep.subr.mxu0 %v372_v4  ;;  %597 = vmatpush1.msra.mxu1 %v518_v17  ;;  %v569_v45 = vld [vmem:[%s1592_s25 + $0x1d8] sm:$0xff]  ;;  %v568_v47 = vld [vmem:[%s1592_s25 + $0x1d0] sm:$0xff]  ;;  %v414_v48 = vld [vmem:[%s1586_s29 + $0x168] sm:$0xff] }
 0x125   : > { %462 = vmatpush1.msra.mxu0 %v371_v6  ;;  %598 = vmatprep.subr.mxu1 %v517_v19  ;;  %v567_v49 = vld [vmem:[%s1592_s25 + $0x1c8] sm:$0xff]  ;;  %v413_v50 = vld [vmem:[%s1586_s29 + $0x160] sm:$0xff]  ;;  %v412_v52 = vld [vmem:[%s1586_s29 + $0x158] sm:$0xff] }
 0x126   : > { %463 = vmatprep.subr.mxu0 %v370_v8  ;;  %599 = vmatpush1.msra.mxu1 %v516_v21  ;;  %v566_v51 = vld [vmem:[%s1592_s25 + $0x1c0] sm:$0xff]  ;;  %v565_v53 = vld [vmem:[%s1592_s25 + $0x1b8] sm:$0xff]  ;;  %v411_v54 = vld [vmem:[%s1586_s29 + $0x150] sm:$0xff] }
 0x127   : > { %464 = vmatpush1.msra.mxu0 %v369_v10  ;;  %600 = vmatprep.subr.mxu1 %v515_v23  ;;  %v564_v55 = vld [vmem:[%s1592_s25 + $0x1b0] sm:$0xff]  ;;  %v410_v56 = vld [vmem:[%s1586_s29 + $0x148] sm:$0xff]  ;;  %v409_v58 = vld [vmem:[%s1586_s29 + $0x140] sm:$0xff] }
 0x128   : > { %465 = vmatprep.subr.mxu0 %v432_v12  ;;  %601 = vmatpush1.msra.mxu1 %v514_v25  ;;  %v563_v57 = vld [vmem:[%s1592_s25 + $0x1a8] sm:$0xff]  ;;  %v562_v59 = vld [vmem:[%s1592_s25 + $0x1a0] sm:$0xff]  ;;  %v408_v60 = vld [vmem:[%s1586_s29 + $0x138] sm:$0xff] }
 0x129   : > { %466 = vmatpush2.msra.mxu0 %v431_v14  ;;  %602 = vmatprep.subr.mxu1 %v513_v27  ;;  %v561_v61 = vld [vmem:[%s1592_s25 + $0x198] sm:$0xff]  ;;  %v407_v62 = vld [vmem:[%s1586_s29 + $0x130] sm:$0xff]  ;;  %v406_v0 = vld [vmem:[%s1586_s29 + $0x128] sm:$0xff] }
 0x12a   : > { %467 = vmatprep.subr.mxu0 %v430_v16  ;;  %603 = vmatpush1.msra.mxu1 %v512_v29  ;;  %v560_v63 = vld [vmem:[%s1592_s25 + $0x190] sm:$0xff]  ;;  %v559_v1 = vld [vmem:[%s1592_s25 + $0x188] sm:$0xff]  ;;  %v405_v2 = vld [vmem:[%s1586_s29 + $0x120] sm:$0xff] }
 0x12b   : > { %468 = vmatpush2.msra.mxu0 %v429_v18  ;;  %604 = vmatprep.subr.mxu1 %v511_v31  ;;  %v558_v3 = vld [vmem:[%s1592_s25 + $0x180] sm:$0xff]  ;;  %v404_v4 = vld [vmem:[%s1586_s29 + $0x118] sm:$0xff]  ;;  %v403_v6 = vld [vmem:[%s1586_s29 + $0x110] sm:$0xff] }
 0x12c   : > { %469 = vmatprep.subr.mxu0 %v428_v20  ;;  %497 = vmatprep.mubr.f32.mxu0 %v1675_v33  ;;  %v557_v5 = vld [vmem:[%s1592_s25 + $0x178] sm:$0xff]  ;;  %v556_v7 = vld [vmem:[%s1592_s25 + $0x170] sm:$0xff]  ;;  %v402_v8 = vld [vmem:[%s1586_s29 + $0x108] sm:$0xff] }
 0x12d   : > { %470 = vmatpush2.msra.mxu0 %v427_v22  ;;  %605 = vmatpush1.msra.mxu1 %v510_v35  ;;  %v555_v9 = vld [vmem:[%s1592_s25 + $0x168] sm:$0xff]  ;;  %v401_v10 = vld [vmem:[%s1586_s29 + $0x100] sm:$0xff]  ;;  %v365_v12 = vld [vmem:[#allocation2 + $0x10] sm:$0xff] }
 0x12e   : > { %471 = vmatprep.subr.mxu0 %v426_v24  ;;  %606 = vmatprep.subr.mxu1 %v573_v37  ;;  %v554_v11 = vld [vmem:[%s1592_s25 + $0x160] sm:$0xff]  ;;  %v553_v13 = vld [vmem:[%s1592_s25 + $0x158] sm:$0xff]  ;;  %v368_v14 = vld [vmem:[#allocation2 + $0x8] sm:$0xff] }
 0x12f   : > { %472 = vmatpush2.msra.mxu0 %v425_v26  ;;  %607 = vmatpush2.msra.mxu1 %v572_v39  ;;  %v552_v15 = vld [vmem:[%s1592_s25 + $0x150] sm:$0xff]  ;;  %v551_v16 = vld [vmem:[%s1592_s25 + $0x148] sm:$0xff]  ;;  %v550_v17 = vld [vmem:[%s1592_s25 + $0x140] sm:$0xff] }
 0x130   : > { %473 = vmatprep.subr.mxu0 %v424_v28  ;;  %608 = vmatprep.subr.mxu1 %v571_v41  ;;  %v718_v18 = vld [vmem:[%s1594_s10 + $0xf8] sm:$0xff]  ;;  %v548_v21 = vld [vmem:[%s1592_s25 + $0x130] sm:$0xff]  ;;  %v547_v23 = vld [vmem:[%s1592_s25 + $0x128] sm:$0xff] }
 0x131   : > { %474 = vmatpush2.msra.mxu0 %v423_v30  ;;  %609 = vmatpush2.msra.mxu1 %v570_v43  ;;  %v367_v19 = vld [vmem:[#allocation2 + $0x18] sm:$0xff]  ;;  %v717_v22 = vld [vmem:[%s1594_s10 + $0xf0] sm:$0xff]  ;;  %v716_v24 = vld [vmem:[%s1594_s10 + $0xe8] sm:$0xff] }
 0x132   : > { %475 = vmatprep.subr.mxu0 %v422_v32  ;;  %610 = vmatprep.subr.mxu1 %v569_v45  ;;  %v549_v20 = vld [vmem:[%s1592_s25 + $0x138] sm:$0xff]  ;;  %v546_v25 = vld [vmem:[%s1592_s25 + $0x120] sm:$0xff]  ;;  %v544_v29 = vld [vmem:[%s1592_s25 + $0x110] sm:$0xff] }
 0x133   : > { %476 = vmatpush2.msra.mxu0 %v421_v34  ;;  %611 = vmatpush2.msra.mxu1 %v568_v47  ;;  %v715_v26 = vld [vmem:[%s1594_s10 + $0xe0] sm:$0xff]  ;;  %v545_v27 = vld [vmem:[%s1592_s25 + $0x118] sm:$0xff]  ;;  %v713_v30 = vld [vmem:[%s1594_s10 + $0xd0] sm:$0xff] }
 0x134   : > { %477 = vmatprep.subr.mxu0 %v420_v36  ;;  %612 = vmatprep.subr.mxu1 %v567_v49  ;;  %v714_v28 = vld [vmem:[%s1594_s10 + $0xd8] sm:$0xff]  ;;  %v543_v31 = vld [vmem:[%s1592_s25 + $0x108] sm:$0xff]  ;;  %v711_v34 = vld [vmem:[%s1594_s10 + $0xc0] sm:$0xff] }
 0x135   : > { %478 = vmatpush2.msra.mxu0 %v419_v38  ;;  %613 = vmatpush2.msra.mxu1 %v566_v51  ;;  %v712_v32 = vld [vmem:[%s1594_s10 + $0xc8] sm:$0xff]  ;;  %v710_v35 = vld [vmem:[%s1594_s10 + $0xb8] sm:$0xff]  ;;  %v709_v36 = vld [vmem:[%s1594_s10 + $0xb0] sm:$0xff] }
 0x136   : > { %479 = vmatprep.subr.mxu0 %v418_v40  ;;  %614 = vmatprep.subr.mxu1 %v565_v53  ;;  %v708_v37 = vld [vmem:[%s1594_s10 + $0xa8] sm:$0xff]  ;;  %v707_v38 = vld [vmem:[%s1594_s10 + $0xa0] sm:$0xff]  ;;  %v706_v39 = vld [vmem:[%s1594_s10 + $0x98] sm:$0xff] }
 0x137   : > { %480 = vmatpush2.msra.mxu0 %v417_v42  ;;  %615 = vmatpush2.msra.mxu1 %v564_v55  ;;  %v705_v40 = vld [vmem:[%s1594_s10 + $0x90] sm:$0xff]  ;;  %v704_v41 = vld [vmem:[%s1594_s10 + $0x88] sm:$0xff]  ;;  %v703_v42 = vld [vmem:[%s1594_s10 + $0x80] sm:$0xff] }
 0x138   : > { %481 = vmatprep.subr.mxu0 %v416_v44  ;;  %616 = vmatprep.subr.mxu1 %v563_v57  ;;  %v702_v43 = vld [vmem:[%s1594_s10 + $0x78] sm:$0xff]  ;;  %v701_v44 = vld [vmem:[%s1594_s10 + $0x70] sm:$0xff]  ;;  %v700_v45 = vld [vmem:[%s1594_s10 + $0x68] sm:$0xff] }
 0x139   : > { %482 = vmatpush2.msra.mxu0 %v415_v46  ;;  %617 = vmatpush2.msra.mxu1 %v562_v59  ;;  %v699_v46 = vld [vmem:[%s1594_s10 + $0x60] sm:$0xff]  ;;  %v698_v47 = vld [vmem:[%s1594_s10 + $0x58] sm:$0xff]  ;;  %v696_v49 = vld [vmem:[%s1594_s10 + $0x48] sm:$0xff] }
 0x13a   : > { %483 = vmatprep.subr.mxu0 %v414_v48  ;;  %618 = vmatprep.subr.mxu1 %v561_v61  ;;  %v697_v48 = vld [vmem:[%s1594_s10 + $0x50] sm:$0xff]  ;;  %v694_v51 = vld [vmem:[%s1594_s10 + $0x38] sm:$0xff]  ;;  %v692_v53 = vld [vmem:[%s1594_s10 + $0x28] sm:$0xff] }
 0x13b   : > { %484 = vmatpush2.msra.mxu0 %v413_v50  ;;  %619 = vmatpush2.msra.mxu1 %v560_v63  ;;  %v695_v50 = vld [vmem:[%s1594_s10 + $0x40] sm:$0xff]  ;;  %v690_v55 = vld [vmem:[%s1594_s10 + $0x18] sm:$0xff]  ;;  %v688_v57 = vld [vmem:[%s1594_s10 + $0x8] sm:$0xff] }
 0x13c   : > { %485 = vmatprep.subr.mxu0 %v412_v52  ;;  %620 = vmatprep.subr.mxu1 %v559_v1  ;;  %v693_v52 = vld [vmem:[%s1594_s10 + $0x30] sm:$0xff]  ;;  %v750_v59 = vld [vmem:[%s1594_s10 + $0x1f8] sm:$0xff]  ;;  %v748_v61 = vld [vmem:[%s1594_s10 + $0x1e8] sm:$0xff] }
 0x13d   : > { %486 = vmatpush2.msra.mxu0 %v411_v54  ;;  %621 = vmatpush2.msra.mxu1 %v558_v3  ;;  %v691_v54 = vld [vmem:[%s1594_s10 + $0x20] sm:$0xff]  ;;  %v746_v63 = vld [vmem:[%s1594_s10 + $0x1d8] sm:$0xff]  ;;  %v744_v1 = vld [vmem:[%s1594_s10 + $0x1c8] sm:$0xff] }
 0x13e   : > { %487 = vmatprep.subr.mxu0 %v410_v56  ;;  %622 = vmatprep.subr.mxu1 %v557_v5  ;;  %v689_v56 = vld [vmem:[%s1594_s10 + $0x10] sm:$0xff]  ;;  %v742_v3 = vld [vmem:[%s1594_s10 + $0x1b8] sm:$0xff]  ;;  %v740_v5 = vld [vmem:[%s1594_s10 + $0x1a8] sm:$0xff] }
 0x13f   : > { %488 = vmatpush2.msra.mxu0 %v409_v58  ;;  %623 = vmatpush2.msra.mxu1 %v556_v7  ;;  %v687_v58 = vld [vmem:[%s1594_s10] sm:$0xff]  ;;  %v738_v7 = vld [vmem:[%s1594_s10 + $0x198] sm:$0xff] }
 0x140   : > { %489 = vmatprep.subr.mxu0 %v408_v60  ;;  %624 = vmatprep.subr.mxu1 %v555_v9  ;;  %v749_v60 = vld [vmem:[%s1594_s10 + $0x1f0] sm:$0xff]  ;;  %v736_v9 = vld [vmem:[%s1594_s10 + $0x188] sm:$0xff] }
 0x141   : > { %490 = vmatpush2.msra.mxu0 %v407_v62  ;;  %625 = vmatpush2.msra.mxu1 %v554_v11  ;;  %v747_v62 = vld [vmem:[%s1594_s10 + $0x1e0] sm:$0xff]  ;;  %v734_v11 = vld [vmem:[%s1594_s10 + $0x178] sm:$0xff] }
 0x142   : > { %491 = vmatprep.subr.mxu0 %v406_v0  ;;  %626 = vmatprep.subr.mxu1 %v553_v13  ;;  %v745_v0 = vld [vmem:[%s1594_s10 + $0x1d0] sm:$0xff]  ;;  %v732_v13 = vld [vmem:[%s1594_s10 + $0x168] sm:$0xff] }
 0x143   : > { %492 = vmatpush2.msra.mxu0 %v405_v2  ;;  %627 = vmatpush2.msra.mxu1 %v552_v15  ;;  %v743_v2 = vld [vmem:[%s1594_s10 + $0x1c0] sm:$0xff]  ;;  %v730_v15 = vld [vmem:[%s1594_s10 + $0x158] sm:$0xff] }
 0x144   : > { %493 = vmatprep.subr.mxu0 %v404_v4  ;;  %628 = vmatprep.subr.mxu1 %v551_v16  ;;  %v741_v4 = vld [vmem:[%s1594_s10 + $0x1b0] sm:$0xff] }
 0x145   : > { %494 = vmatpush2.msra.mxu0 %v403_v6  ;;  %638 = vmatprep.mubr.f32.mxu1 %v1675_v33  ;;  %v542_v33 = vld [vmem:[%s1592_s25 + $0x100] sm:$0xff]  ;;  %v729_v16 = vld [vmem:[%s1594_s10 + $0x150] sm:$0xff] }
 0x146   : > { %495 = vmatprep.subr.mxu0 %v402_v8  ;;  %629 = vmatpush2.msra.mxu1 %v550_v17  ;;  %v739_v6 = vld [vmem:[%s1594_s10 + $0x1a0] sm:$0xff]  ;;  %v737_v8 = vld [vmem:[%s1594_s10 + $0x190] sm:$0xff]  ;;  %v728_v17 = vld [vmem:[%s1594_s10 + $0x148] sm:$0xff] }
 0x147   : > { %496 = vmatpush2.msra.mxu0 %v401_v10  ;;  %630 = vmatprep.subr.mxu1 %v549_v20  ;;  %v735_v10 = vld [vmem:[%s1594_s10 + $0x180] sm:$0xff]  ;;  %v725_v20 = vld [vmem:[%s1594_s10 + $0x130] sm:$0xff] }
 0x148   : > { %498 = vmatmul.mubr.f32.vlgmr.msra.gmra.mxu0 %v365_v12  ;;  %751 = vmatprep.subr.mxu0 %v718_v18 }
 0x149   : > { %503 = vmatprep.mubr.f32.mxu0 %v368_v14  ;;  %631 = vmatpush2.msra.mxu1 %v548_v21  ;;  %v724_v21 = vld [vmem:[%s1594_s10 + $0x128] sm:$0xff] }
 0x14a   : > { %752 = vmatpush1.msra.mxu0 %v717_v22  ;;  %632 = vmatprep.subr.mxu1 %v547_v23  ;;  %v722_v23 = vld [vmem:[%s1594_s10 + $0x118] sm:$0xff] }
 0x14b   : > { %753 = vmatprep.subr.mxu0 %v716_v24  ;;  %633 = vmatpush2.msra.mxu1 %v546_v25  ;;  %v720_v25 = vld [vmem:[%s1594_s10 + $0x108] sm:$0xff] }
 0x14c   : > { %504 = vmatmul.mubr.f32.gmra.mxu0 %v367_v19  ;;  %634 = vmatprep.subr.mxu1 %v545_v27 }
 0x14d   : > { %754 = vmatpush1.msra.mxu0 %v715_v26  ;;  %635 = vmatpush2.msra.mxu1 %v544_v29 }
 0x14e   : > { %755 = vmatprep.subr.mxu0 %v714_v28  ;;  %636 = vmatprep.subr.mxu1 %v543_v31 }
 0x14f   : > { %756 = vmatpush1.msra.mxu0 %v713_v30  ;;  %637 = vmatpush2.msra.mxu1 %v542_v33 }
 0x150   : > { %757 = vmatprep.subr.mxu0 %v712_v32  ;;  %639 = vmatmul.mubr.f32.vlgmr.msra.gmra.mxu1 %v365_v12  ;;  %v733_v12 = vld [vmem:[%s1594_s10 + $0x170] sm:$0xff] }
 0x151   : > { %758 = vmatpush1.msra.mxu0 %v711_v34  ;;  %1020 = vmatprep.subr.mxu1 %v718_v18  ;;  %v727_v18 = vld [vmem:[%s1594_s10 + $0x140] sm:$0xff] }
 0x152   : > { %644 = vmatprep.mubr.f32.mxu1 %v368_v14  ;;  %1052 = vmatpush1.msra.mxu1 %v717_v22  ;;  %v731_v14 = vld [vmem:[%s1594_s10 + $0x160] sm:$0xff] }
 0x153   : > { %1021 = vmatprep.subr.mxu1 %v716_v24  ;;  %759 = vmatprep.subr.mxu0 %v710_v35  ;;  %v723_v22 = vld [vmem:[%s1594_s10 + $0x120] sm:$0xff]  ;;  %v721_v24 = vld [vmem:[%s1594_s10 + $0x110] sm:$0xff] }
 0x154   : > { %1053 = vmatpush1.msra.mxu1 %v715_v26  ;;  %760 = vmatpush1.msra.mxu0 %v709_v36  ;;  %v719_v26 = vld [vmem:[%s1594_s10 + $0x100] sm:$0xff] }
 0x155   : > { %645 = vmatmul.mubr.f32.gmra.mxu1 %v367_v19  ;;  %1022 = vmatprep.subr.mxu1 %v714_v28  ;;  %v726_v19 = vld [vmem:[%s1594_s10 + $0x138] sm:$0xff] }
 0x156   : > { %1054 = vmatpush1.msra.mxu1 %v713_v30  ;;  %761 = vmatprep.subr.mxu0 %v708_v37 }
 0x157   : > { %1023 = vmatprep.subr.mxu1 %v712_v32  ;;  %762 = vmatpush1.msra.mxu0 %v707_v38 }
 0x158   : > { %1055 = vmatpush1.msra.mxu1 %v711_v34  ;;  %763 = vmatprep.subr.mxu0 %v706_v39 }
 0x159   : > { %1024 = vmatprep.subr.mxu1 %v710_v35  ;;  %764 = vmatpush1.msra.mxu0 %v705_v40 }
 0x15a   : > { %1056 = vmatpush1.msra.mxu1 %v709_v36  ;;  %765 = vmatprep.subr.mxu0 %v704_v41 }
 0x15b   : > { %1025 = vmatprep.subr.mxu1 %v708_v37  ;;  %766 = vmatpush1.msra.mxu0 %v703_v42 }
 0x15c   : > { %1057 = vmatpush1.msra.mxu1 %v707_v38  ;;  %767 = vmatprep.subr.mxu0 %v702_v43 }
 0x15d   : > { %1026 = vmatprep.subr.mxu1 %v706_v39  ;;  %768 = vmatpush1.msra.mxu0 %v701_v44 }
 0x15e   : > { %1058 = vmatpush1.msra.mxu1 %v705_v40  ;;  %769 = vmatprep.subr.mxu0 %v700_v45 }
 0x15f   : > { %1027 = vmatprep.subr.mxu1 %v704_v41  ;;  %770 = vmatpush1.msra.mxu0 %v699_v46 }
 0x160   : > { %1059 = vmatpush1.msra.mxu1 %v703_v42  ;;  %771 = vmatprep.subr.mxu0 %v698_v47 }
 0x161   : > { %1028 = vmatprep.subr.mxu1 %v702_v43  ;;  %772 = vmatpush1.msra.mxu0 %v697_v48 }
 0x162   : > { %1060 = vmatpush1.msra.mxu1 %v701_v44  ;;  %773 = vmatprep.subr.mxu0 %v696_v49 }
 0x163   : > { %1029 = vmatprep.subr.mxu1 %v700_v45  ;;  %774 = vmatpush1.msra.mxu0 %v695_v50 }
 0x164   : > { %1061 = vmatpush1.msra.mxu1 %v699_v46  ;;  %775 = vmatprep.subr.mxu0 %v694_v51 }
 0x165   : > { %1030 = vmatprep.subr.mxu1 %v698_v47  ;;  %776 = vmatpush1.msra.mxu0 %v693_v52 }
 0x166   : > { %1062 = vmatpush1.msra.mxu1 %v697_v48  ;;  %777 = vmatprep.subr.mxu0 %v692_v53 }
 0x167   : > { %1031 = vmatprep.subr.mxu1 %v696_v49  ;;  %778 = vmatpush1.msra.mxu0 %v691_v54 }
 0x168   : > { %1063 = vmatpush1.msra.mxu1 %v695_v50  ;;  %779 = vmatprep.subr.mxu0 %v690_v55 }
 0x169   : > { %1032 = vmatprep.subr.mxu1 %v694_v51  ;;  %780 = vmatpush1.msra.mxu0 %v689_v56 }
 0x16a   : > { %1064 = vmatpush1.msra.mxu1 %v693_v52  ;;  %781 = vmatprep.subr.mxu0 %v688_v57 }
 0x16b   : > { %1033 = vmatprep.subr.mxu1 %v692_v53  ;;  %782 = vmatpush1.msra.mxu0 %v687_v58 }
 0x16c   : > { %1065 = vmatpush1.msra.mxu1 %v691_v54  ;;  %783 = vmatprep.subr.mxu0 %v750_v59 }
 0x16d   : > { %1034 = vmatprep.subr.mxu1 %v690_v55  ;;  %784 = vmatpush2.msra.mxu0 %v749_v60 }
 0x16e   : > { %1066 = vmatpush1.msra.mxu1 %v689_v56  ;;  %785 = vmatprep.subr.mxu0 %v748_v61 }
 0x16f   : > { %1035 = vmatprep.subr.mxu1 %v688_v57  ;;  %786 = vmatpush2.msra.mxu0 %v747_v62 }
 0x170   : > { %1067 = vmatpush1.msra.mxu1 %v687_v58  ;;  %787 = vmatprep.subr.mxu0 %v746_v63 }
 0x171   : > { %1036 = vmatprep.subr.mxu1 %v750_v59  ;;  %788 = vmatpush2.msra.mxu0 %v745_v0  ;;  %v683_v59 = vld [vmem:[#allocation3] sm:$0xff] }
 0x172   : > { %1068 = vmatpush2.msra.mxu1 %v749_v60  ;;  %789 = vmatprep.subr.mxu0 %v744_v1 }
 0x173   : > { %1037 = vmatprep.subr.mxu1 %v748_v61  ;;  %790 = vmatpush2.msra.mxu0 %v743_v2  ;;  %v684_v61 = vld [vmem:[#allocation3 + $0x18] sm:$0xff] }
 0x174   : > { %1069 = vmatpush2.msra.mxu1 %v747_v62  ;;  %791 = vmatprep.subr.mxu0 %v742_v3 }
 0x175   : > { %1038 = vmatprep.subr.mxu1 %v746_v63  ;;  %792 = vmatpush2.msra.mxu0 %v741_v4 }
 0x176   : > { %1070 = vmatpush2.msra.mxu1 %v745_v0  ;;  %793 = vmatprep.subr.mxu0 %v740_v5  ;;  %v685_v0 = vld [vmem:[#allocation3 + $0x8] sm:$0xff] }
 0x177   : > { %1039 = vmatprep.subr.mxu1 %v744_v1  ;;  %794 = vmatpush2.msra.mxu0 %v739_v6 }
 0x178   : > { %1071 = vmatpush2.msra.mxu1 %v743_v2  ;;  %795 = vmatprep.subr.mxu0 %v738_v7 }
 0x179   : > { %1040 = vmatprep.subr.mxu1 %v742_v3  ;;  %796 = vmatpush2.msra.mxu0 %v737_v8  ;;  %v686_v3 = vld [vmem:[#allocation3 + $0x10] sm:$0xff] }
 0x17a   : > { %1072 = vmatpush2.msra.mxu1 %v741_v4  ;;  %797 = vmatprep.subr.mxu0 %v736_v9 }
 0x17b   : > { %1041 = vmatprep.subr.mxu1 %v740_v5  ;;  %798 = vmatpush2.msra.mxu0 %v735_v10 }
 0x17c   : > { %1073 = vmatpush2.msra.mxu1 %v739_v6  ;;  %799 = vmatprep.subr.mxu0 %v734_v11 }
 0x17d   : > { %1042 = vmatprep.subr.mxu1 %v738_v7  ;;  %800 = vmatpush2.msra.mxu0 %v733_v12 }
 0x17e   : > { %1074 = vmatpush2.msra.mxu1 %v737_v8  ;;  %801 = vmatprep.subr.mxu0 %v732_v13 }
 0x17f   : > { %1043 = vmatprep.subr.mxu1 %v736_v9  ;;  %802 = vmatpush2.msra.mxu0 %v731_v14 }
 0x180   : > { %1075 = vmatpush2.msra.mxu1 %v735_v10  ;;  %803 = vmatprep.subr.mxu0 %v730_v15 }
 0x181   : > { %1044 = vmatprep.subr.mxu1 %v734_v11  ;;  %804 = vmatpush2.msra.mxu0 %v729_v16 }
 0x182   : > { %1076 = vmatpush2.msra.mxu1 %v733_v12  ;;  %805 = vmatprep.subr.mxu0 %v728_v17 }
 0x183   : > { %1045 = vmatprep.subr.mxu1 %v732_v13  ;;  %806 = vmatpush2.msra.mxu0 %v727_v18 }
 0x184   : > { %1077 = vmatpush2.msra.mxu1 %v731_v14  ;;  %807 = vmatprep.subr.mxu0 %v726_v19 }
 0x185   : > { %1046 = vmatprep.subr.mxu1 %v730_v15  ;;  %808 = vmatpush2.msra.mxu0 %v725_v20 }
 0x186   : > { %1078 = vmatpush2.msra.mxu1 %v729_v16  ;;  %809 = vmatprep.subr.mxu0 %v724_v21 }
 0x187   : > { %1047 = vmatprep.subr.mxu1 %v728_v17  ;;  %810 = vmatpush2.msra.mxu0 %v723_v22 }
 0x188   : > { %1079 = vmatpush2.msra.mxu1 %v727_v18  ;;  %811 = vmatprep.subr.mxu0 %v722_v23 }
 0x189   : > { %1048 = vmatprep.subr.mxu1 %v726_v19  ;;  %812 = vmatpush2.msra.mxu0 %v721_v24 }
 0x18a   : > { %1080 = vmatpush2.msra.mxu1 %v725_v20  ;;  %813 = vmatprep.subr.mxu0 %v720_v25 }
 0x18b   : > { %1049 = vmatprep.subr.mxu1 %v724_v21  ;;  %814 = vmatpush2.msra.mxu0 %v719_v26 }
 0x18c   : > { %1081 = vmatpush2.msra.mxu1 %v723_v22 }
 0x18d   : > { %1050 = vmatprep.subr.mxu1 %v722_v23 }
 0x18e   : > { %1082 = vmatpush2.msra.mxu1 %v721_v24 }
 0x18f   : > { %1051 = vmatprep.subr.mxu1 %v720_v25 }
 0x190   : > { %1083 = vmatpush2.msra.mxu1 %v719_v26 }
 0x208   : > { %v499_v27 = vpop.f32.mrf.mxu0 }
 0x209   : > { %v1007_v28 = vmul.f32 -1.442695, %v499_v27 }
 0x20a   : > { %v501_v29 = vpop.f32.mrf.mxu0 }
 0x20b   : > { %1177 = vpow2.f32 %v1007_v28  ;;  %v1008_v30 = vmul.f32 -1.442695, %v501_v29 }
 0x20c   : > { %v505_v31 = vpop.f32.mrf.mxu0 }
 0x20d   : > { %1179 = vpow2.f32 %v1008_v30  ;;  %v1009_v32 = vmul.f32 -1.442695, %v505_v31 }
 0x20e   : > { %v507_v33 = vpop.f32.mrf.mxu0 }
 0x20f   : > { %1181 = vpow2.f32 %v1009_v32  ;;  %v1010_v34 = vmul.f32 -1.442695, %v507_v33 }
 0x210   : > { %v640_v43 = vpop.f32.mrf.mxu1 }
 0x211   : > { %1183 = vpow2.f32 %v1010_v34 }
 0x212   : > { %v642_v45 = vpop.f32.mrf.mxu1 }
 0x215   : > { %v646_v50 = vpop.f32.mrf.mxu1 }
 0x217   : > { %v648_v56 = vpop.f32.mrf.mxu1 }
 0x218   : > { %v1178_v35 = vpop.eup %1177 }
 0x219   : > { %v663_v36 = vadd.f32 1.0, %v1178_v35 }
 0x21a   : > { %v1180_v37 = vpop.eup %1179 }
 0x21b   : > { %1185 = vrcp.f32 %v663_v36  ;;  %v664_v38 = vadd.f32 1.0, %v1180_v37 }
 0x21c   : > { %v1182_v39 = vpop.eup %1181 }
 0x21d   : > { %1187 = vrcp.f32 %v664_v38  ;;  %v665_v40 = vadd.f32 1.0, %v1182_v39 }
 0x21e   : > { %v1184_v41 = vpop.eup %1183 }
 0x21f   : > { %1189 = vrcp.f32 %v665_v40  ;;  %v666_v42 = vadd.f32 1.0, %v1184_v41 }
 0x221   : > { %1191 = vrcp.f32 %v666_v42 }
 0x228   : > { %v1186_v44 = vpop.eup %1185 }
 0x229   : > { %v675_v47 = vmul.f32 %v1186_v44, %v499_v27 }
 0x22a   : > { %v1188_v46 = vpop.eup %1187 }
 0x22b   : > { %v676_v48 = vmul.f32 %v1188_v46, %v501_v29  ;;  %v679_v54 = vmul.f32 %v675_v47, %v640_v43 }
 0x22c   : > { %v1190_v49 = vpop.eup %1189 }
 0x22d   : > { %v680_v51 = vmul.f32 %v676_v48, %v642_v45  ;;  %v677_v53 = vmul.f32 %v1190_v49, %v505_v31 }
 0x22e   : > { %v1192_v52 = vpop.eup %1191 }
 0x22f   : > { %v678_v55 = vmul.f32 %v1192_v52, %v507_v33  ;;  %815 = vmatprep.mubr.f32.mxu0 %v680_v51  ;;  %v681_v58 = vmul.f32 %v677_v53, %v646_v50 }
 0x230   : > { %816 = vmatmul.mubr.f32.vlgmr.msra.gmra.mxu0 %v679_v54 }
 0x231   : > { %v682_v57 = vmul.f32 %v678_v55, %v648_v56 }
 0x233   : > { %821 = vmatprep.mubr.f32.mxu1 %v682_v57 }
 0x234   : > { %822 = vmatmul.mubr.f32.vlgmr.msra.gmra.mxu1 %v681_v58 }
 0x2f0   : > { %v817_v60 = vpop.f32.mrf.mxu0 }
 0x2f1   : > { %v828_v62 = vadd.f32 %v817_v60, %v683_v59 }
 0x2f2   : > { %v819_v63 = vpop.f32.mrf.mxu0 }
 0x2f3   : > { %832 = vst [vmem:[#allocation3] sm:$0xff] %v828_v62  ;;  %v829_v1 = vadd.f32 %v819_v63, %v684_v61 }
 0x2f4   : > { %v823_v2 = vpop.f32.mrf.mxu1 }
 0x2f5   : > { %833 = vst [vmem:[#allocation3 + $0x18] sm:$0xff] %v829_v1  ;;  %v830_v4 = vadd.f32 %v823_v2, %v685_v0  ;;  %839 = sbr.rel (%p1011_p7) target bundleno = 772 (0x304), region = 60 }
 0x2f6   : > { %v825_v5 = vpop.f32.mrf.mxu1 }
 0x2f7   : > { %834 = vst [vmem:[#allocation3 + $0x8] sm:$0xff] %v830_v4  ;;  %v831_v6 = vadd.f32 %v825_v5, %v686_v3 }
 0x2f9   : > { %835 = vst [vmem:[#allocation3 + $0x10] sm:$0xff] %v831_v6 }
 0x2fa   : > { %v840_v7 = vld [vmem:[#allocation4] sm:$0xff]  ;;  %v841_v9 = vld [vmem:[#allocation4 + $0x8] sm:$0xff]  ;;  %v842_v12 = vld [vmem:[#allocation4 + $0x10] sm:$0xff] }
 0x2fb   : > { %v844_v8 = vld [vmem:[#allocation3] sm:$0xff]  ;;  %v843_v16 = vld [vmem:[#allocation4 + $0x18] sm:$0xff] }
 0x2fc   : > { %v848_v10 = vadd.f32 %v844_v8, %v840_v7  ;;  %v845_v11 = vld [vmem:[#allocation3 + $0x18] sm:$0xff] }
 0x2fd   : > { %v849_v14 = vadd.f32 %v845_v11, %v841_v9 }
 0x2fe   : > { %v846_v13 = vld [vmem:[#allocation3 + $0x8] sm:$0xff]  ;;  %852 = vst [vmem:[#allocation12] sm:$0xff] %v848_v10 }
 0x2ff   : > { %v850_v15 = vadd.f32 %v846_v13, %v842_v12  ;;  %853 = vst [vmem:[#allocation12 + $0x8] sm:$0xff] %v849_v14 }
 0x300   : > { %v847_v17 = vld [vmem:[#allocation3 + $0x10] sm:$0xff] }
 0x301   : > { %v851_v18 = vadd.f32 %v847_v17, %v843_v16  ;;  %854 = vst [vmem:[#allocation12 + $0x10] sm:$0xff] %v850_v15 }
 0x303   : > { %855 = vst [vmem:[#allocation12 + $0x18] sm:$0xff] %v851_v18 }
 0x304 PF: > { %p1115_p2 = scmp.eq.s32.totalorder %s1510_s5, 2  ;;  %s1399_s18 = smov [#allocation12]  }
 0x305   : > { %s866_s7 = sshll.u32 %s1399_s18, 4  ;;  %s867_s7 = int_to_ptr.vmem [resolvable:$true] %s866_s7 }
 0x306   : > { %s1303_s11 = scalar_lea.vmem %s867_s7, 512  ;;  %p1310_p4 = scmp.lt.s32.totalorder %s867_s7, %s867_s7 }
 0x307   : > { %p1304_p5 = scmp.ne.s32.totalorder %s867_s7, %s1303_s11  ;;  %p1311_p9 = scmp.lt.s32.totalorder %s1303_s11, %s1303_s11 }
 0x309   : > { %p1305_p8 = pnand %p1304_p5, %p1115_p2  ;;  %p1312_p11 = por %p1311_p9, %p1310_p4 }
 0x30b   : > { %p1306_p3 = pneg %p1305_p8 }
 0x30d   : > { %p1313_p12 = pnand %p1312_p11, %p1306_p3 }
 0x30f   : > { %1316 = shalt.err (!%p1313_p12)
}
 0x310   : > { %s1400_s23 = smov 256   ;;  %s1401_s24 = smov 16  }
 0x311   : > { %1095 = dma.vmem_to_hbm [thread:$0]  (%p1115_p2), %s867_s7, 512, %s1832_s4, [#allocation6], %s1400_s23, %s1400_s23, %s1401_s24  }
 0x312   : > { %1364 = dma.done.wait (%p1115_p2), [#allocation6], 512  }
 0x313   : > { %1366 = vsyncadd (%p1115_p2), [#allocation6], 4294966784 }
 0x314 PF: > { %s22_s20 = sadd.s32 1, %s1389_s20   ;;  %s1838_s15 = smov %s1373_s16 }
 0x315   : > { %p19_p10 = scmp.ge.s32.totalorder %s22_s20, 5   ;;  %s1839_s16 = smov %s1377_s17 }
 0x316   : > { %s1840_s17 = smov %s1474_s27  ;;  %s1841_s18 = smov %s1385_s19 }
 0x317   : > { %s1842_s19 = smov %s1844_s21  ;;  %21 = sbr.rel (!%p19_p10) target bundleno = 8 (0x8), region = 112 }
 0x31c   :  { %882 = vsyncpa [#allocation5], 1 }
 0x31d   :  { %884 = vsyncpa [#allocation5 + $0x1], 1 }
 0x31e   :  { %885 = vsyncpa [#allocation8], 1 }
 0x31f   :  { %887 = vsyncpa [#allocation8 + $0x1], 1 }
 0x320   :  { %888 = vsyncpa [#allocation11], 1 }
 0x321   :  { %890 = vsyncpa [#allocation11 + $0x1], 1 }
 0x322   :  { %891 = vsyncpa [#allocation6], 1 }
 0x323   :  { %893 = vsyncpa [#allocation6 + $0x1], 1 }

</bundles_post_ra>
